<compile_context>
chip_gen: v6e
topology: v6e:2x2x1
jax: 0.10.0
libtpu: 0.0.40
codegen_flags: <defaults>
</compile_context>

<pallas_src>
import jax
import jax.numpy as jnp
from jax.experimental import pallas as pl
from jax.experimental.pallas import tpu as pltpu

# The reference module reads an (undefined) module-level global `loss_func`.
# Both branches ('CW' and the CrossEntropy fallback) are implemented; default 'CE'.
LOSS_FUNC = "CE"
CW_KAPPA = -1.0  # kappa default in CWLoss


def _make_loss_kernel(loss_func: str, kappa: float, n_maps: int):
    """Fused loss kernel: classification-term sum + scaled-MSE sum for one batch tile."""

    def kernel(labels_ref, delta_ref, po_ref, pa_ref, *refs):
        out_ref = refs[-1]          # (1, 8, 128) f32 partial-sum block for this tile
        map_refs = refs[:-1]        # 2*n_maps refs: (ori_0, adv_0, ori_1, adv_1, ...)

        labels = labels_ref[...]                      # (Bt, 1) int32
        bt = labels.shape[0]

        def cls_term(logits_ref):
            logits = logits_ref[...].astype(jnp.float32)          # native dtype -> f32
            c = logits.shape[-1]
            col = jax.lax.broadcasted_iota(jnp.int32, (bt, c), 1)
            mask = col == labels                                  # (Bt, C) target mask
            real = jnp.sum(jnp.where(mask, logits, 0.0), axis=-1, keepdims=True)
            if loss_func == "CW":
                # other = max over non-target classes (target forced to -10000,
                # matching the PyTorch (1-onehot)*x - onehot*10000 construction)
                other = jnp.max(jnp.where(mask, -10000.0, logits),
                                axis=-1, keepdims=True)
                return jnp.sum(jnp.maximum(other - real, kappa))
            else:
                # CrossEntropy numerator: sum_b (logsumexp(logits_b) - logit_label_b);
                # the batch mean is applied in the wrapper.
                m = jnp.max(logits, axis=-1, keepdims=True)
                lse = m + jnp.log(jnp.sum(jnp.exp(logits - m), axis=-1, keepdims=True))
                return jnp.sum(lse - real)

        cls_sum = cls_term(po_ref) + cls_term(pa_ref)

        # Mid-layer term: sum_{b,f} ((v1 - v2) / delta_b)^2 ; mean applied in wrapper.
        inv_d = pl.reciprocal(delta_ref[...].astype(jnp.float32), approx=False)  # (Bt,1)
        mse_sum = jnp.float32(0.0)
        for i in range(n_maps):
            v1 = map_refs[2 * i][...].astype(jnp.float32)
            v2 = map_refs[2 * i + 1][...].astype(jnp.float32)
            d = (v1 - v2) * inv_d
            mse_sum = mse_sum + jnp.sum(d * d)

        # Lane-dense partial-sum block: lane 0 = cls_sum, lane 1 = mse_sum.
        lane = jax.lax.broadcasted_iota(jnp.int32, (1, 8, 128), 2)
        out_ref[...] = jnp.where(lane == 0, cls_sum,
                                 jnp.where(lane == 1, mse_sum, 0.0))

    return kernel


def _pick_batch_tile(B: int, row_bytes: int) -> int:
    """Largest batch tile (multiple of 8, divisor of B) fitting ~8 MiB double-buffered."""
    if B <= 8 or B % 8 != 0:
        return B
    budget = 4 * 1024 * 1024  # per pipeline buffer; x2 for double-buffering
    bt = max(8, min(B, (budget // max(row_bytes, 1)) // 8 * 8))
    while B % bt != 0:
        bt -= 8
    return max(bt, 8)


def lossfunc_forward(pred_ori, pred_advs, labels, midlayer_ori, midlayer_advs, delta,
                     alpha1, alpha2, loss_func=LOSS_FUNC):
    """Forward pass of Lossfunc. Returns (alpha1*(term11+term12), alpha2*term2)."""
    B, C = pred_ori.shape

    # getMidLayerVector on the [1:-2] slice (static Python list handling).
    maps_ori = list(midlayer_ori[1:-2])
    maps_adv = list(midlayer_advs[1:-2])
    n_maps = len(maps_ori)
    F_total = sum(int(m.shape[1]) for m in maps_ori)

    # Tiny index/scale inputs (no (B, C) one-hot is ever materialized).
    labels2d = labels.astype(jnp.int32).reshape(B, 1)
    delta2d = delta.reshape(B, 1)

    # Batch-tile size picked from per-row bytes of all tiled inputs (native dtypes).
    row_bytes = 2 * C * pred_ori.dtype.itemsize
    for m in maps_ori:
        row_bytes += 2 * int(m.shape[1]) * m.dtype.itemsize
    Bt = _pick_batch_tile(B, row_bytes)
    nbt = B // Bt

    interleaved = []
    for m1, m2 in zip(maps_ori, maps_adv):
        interleaved += [m1, m2]

    in_specs = [
        pl.BlockSpec((Bt, 1), lambda i: (i, 0)),   # labels
        pl.BlockSpec((Bt, 1), lambda i: (i, 0)),   # delta
        pl.BlockSpec((Bt, C), lambda i: (i, 0)),   # pred_ori (native dtype)
        pl.BlockSpec((Bt, C), lambda i: (i, 0)),   # pred_advs (native dtype)
    ]
    for m in interleaved:
        in_specs.append(pl.BlockSpec((Bt, int(m.shape[1])), lambda i: (i, 0)))

    out_spec = pl.BlockSpec((1, 8, 128), lambda i: (i, 0, 0))

    kernel = _make_loss_kernel(loss_func, CW_KAPPA, n_maps)
    partials = pl.pallas_call(
        kernel,
        out_shape=jax.ShapeDtypeStruct((nbt, 8, 128), jnp.float32),
        grid=(nbt,),
        in_specs=in_specs,
        out_specs=out_spec,
        compiler_params=pltpu.CompilerParams(
            dimension_semantics=("parallel",)),   # batch tiles are independent
    )(labels2d, delta2d, pred_ori, pred_advs, *interleaved)

    cls_sum = jnp.sum(partials[:, 0, 0])
    mse_sum = jnp.sum(partials[:, 0, 1])

    if loss_func == "CW":
        term1 = cls_sum                 # CWLoss sums over the batch (no mean)
    else:
        term1 = cls_sum / B             # each CrossEntropyLoss is a batch mean
    term2 = mse_sum / (B * F_total)     # MSELoss mean over all elements

    return alpha1 * term1, alpha2 * term2


def _reference_forward(pred_ori, pred_advs, labels, midlayer_ori, midlayer_advs, delta,
                       alpha1, alpha2, loss_func=LOSS_FUNC):
    """Pure-JAX reference for correctness checking (mirrors the PyTorch code)."""
    C = pred_ori.shape[1]
    onehot = jax.nn.one_hot(labels, C, dtype=jnp.float32)
    po = pred_ori.astype(jnp.float32)
    pa = pred_advs.astype(jnp.float32)

    def cw(logits):
        real = jnp.sum(onehot * logits, axis=1)
        other = jnp.max((1.0 - onehot) * logits - onehot * 10000.0, axis=1)
        return jnp.sum(jnp.maximum(other - real, CW_KAPPA))

    def ce(logits):
        lse = jax.scipy.special.logsumexp(logits, axis=1)
        real = jnp.sum(onehot * logits, axis=1)
        return jnp.mean(lse - real)

    f = cw if loss_func == "CW" else ce
    term1 = f(po) + f(pa)
    v1 = jnp.concatenate([m.astype(jnp.float32) for m in midlayer_ori[1:-2]], axis=1)
    v2 = jnp.concatenate([m.astype(jnp.float32) for m in midlayer_advs[1:-2]], axis=1)
    d = delta[:, None]
    term2 = jnp.mean((v1 / d - v2 / d) ** 2)
    return alpha1 * term1, alpha2 * term2


if __name__ == "__main__":
    key = jax.random.PRNGKey(0)
    B, C, Fi, n_maps = 2, 1000, 32, 5   # batch, classes (eye(1000) in CWLoss), per-map feat, #maps
    alpha1, alpha2 = 1.0, 0.5

    keys = jax.random.split(key, 4 + 2 * n_maps)
    # Native bf16 activations/logits (cast to f32 only inside the kernel).
    pred_ori = jax.random.normal(keys[0], (B, C), dtype=jnp.float32).astype(jnp.bfloat16)
    pred_advs = jax.random.normal(keys[1], (B, C), dtype=jnp.float32).astype(jnp.bfloat16)
    labels = jax.random.randint(keys[2], (B,), 0, C, dtype=jnp.int32)
    delta = jax.random.uniform(keys[3], (B,), dtype=jnp.float32, minval=0.5, maxval=1.5)
    midlayer_ori = [jax.random.normal(keys[4 + i], (B, Fi), dtype=jnp.float32).astype(jnp.bfloat16)
                    for i in range(n_maps)]
    midlayer_advs = [jax.random.normal(keys[4 + n_maps + i], (B, Fi), dtype=jnp.float32).astype(jnp.bfloat16)
                     for i in range(n_maps)]

    for lf in ("CE", "CW"):
        out1, out2 = lossfunc_forward(pred_ori, pred_advs, labels,
                                      midlayer_ori, midlayer_advs, delta,
                                      alpha1, alpha2, loss_func=lf)
        jax.block_until_ready((out1, out2))

        ref1, ref2 = _reference_forward(pred_ori, pred_advs, labels,
                                        midlayer_ori, midlayer_advs, delta,
                                        alpha1, alpha2, loss_func=lf)
        assert jnp.allclose(out1, ref1, rtol=1e-5, atol=1e-5), (lf, out1, ref1)
        assert jnp.allclose(out2, ref2, rtol=1e-5, atol=1e-5), (lf, out2, ref2)

    print("KERNEL_OK")
</pallas_src>

<mosaic_0001>
module attributes {stable_mosaic.version = 11 : i64} {
  func.func @kernel(%arg0: i32, %arg1: memref<2x1xi32, #tpu.memory_space<vmem>>, %arg2: memref<2x1xf32, #tpu.memory_space<vmem>>, %arg3: memref<2x1000xbf16, #tpu.memory_space<vmem>>, %arg4: memref<2x1000xbf16, #tpu.memory_space<vmem>>, %arg5: memref<2x32xbf16, #tpu.memory_space<vmem>>, %arg6: memref<2x32xbf16, #tpu.memory_space<vmem>>, %arg7: memref<2x32xbf16, #tpu.memory_space<vmem>>, %arg8: memref<2x32xbf16, #tpu.memory_space<vmem>>, %arg9: memref<1x8x128xf32, #tpu.memory_space<vmem>>) attributes {dimension_semantics = [#tpu.dimension_semantics<parallel>], iteration_bounds = array<i64: 1>, scalar_prefetch = 0 : i64, scratch_operands = 0 : i64, tpu.core_type = #tpu.core_type<tc>, window_params = [{transform_indices = @transform_0, window_bounds = array<i64: 2, 1>}, {transform_indices = @transform_1, window_bounds = array<i64: 2, 1>}, {transform_indices = @transform_2, window_bounds = array<i64: 2, 1000>}, {transform_indices = @transform_3, window_bounds = array<i64: 2, 1000>}, {transform_indices = @transform_4, window_bounds = array<i64: 2, 32>}, {transform_indices = @transform_5, window_bounds = array<i64: 2, 32>}, {transform_indices = @transform_6, window_bounds = array<i64: 2, 32>}, {transform_indices = @transform_7, window_bounds = array<i64: 2, 32>}, {transform_indices = @transform_8, window_bounds = array<i64: 1, 8, 128>}]} {
    %c0 = arith.constant 0 : index
    %c0_0 = arith.constant 0 : index
    %0 = vector.load %arg1[%c0, %c0_0] : memref<2x1xi32, #tpu.memory_space<vmem>>, vector<2x1xi32>
    %c0_1 = arith.constant 0 : index
    %c0_2 = arith.constant 0 : index
    %1 = vector.load %arg3[%c0_1, %c0_2] : memref<2x1000xbf16, #tpu.memory_space<vmem>>, vector<2x1000xbf16>
    %2 = arith.extf %1 : vector<2x1000xbf16> to vector<2x1000xf32>
    %3 = tpu.iota {dimensions = array<i32: 1>} : vector<2x1000xi32>
    %4 = vector.broadcast %0 : vector<2x1xi32> to vector<2x1000xi32>
    %5 = arith.cmpi eq, %3, %4 : vector<2x1000xi32>
    %cst = arith.constant 0.000000e+00 : f32
    %6 = vector.broadcast %cst : f32 to vector<2x1000xf32>
    %7 = arith.select %5, %2, %6 : vector<2x1000xi1>, vector<2x1000xf32>
    %cst_3 = arith.constant dense<0.000000e+00> : vector<2xf32>
    %8 = vector.multi_reduction <add>, %7, %cst_3 [1] : vector<2x1000xf32> to vector<2xf32>
    %9 = vector.shape_cast %8 : vector<2xf32> to vector<2x1xf32>
    %cst_4 = arith.constant dense<0xFF800000> : vector<2xf32>
    %10 = vector.multi_reduction <maximumf>, %2, %cst_4 [1] : vector<2x1000xf32> to vector<2xf32>
    %11 = vector.shape_cast %10 : vector<2xf32> to vector<2x1xf32>
    %12 = vector.broadcast %11 : vector<2x1xf32> to vector<2x1000xf32>
    %13 = arith.subf %2, %12 : vector<2x1000xf32>
    %14 = math.exp %13 : vector<2x1000xf32>
    %cst_5 = arith.constant dense<0.000000e+00> : vector<2xf32>
    %15 = vector.multi_reduction <add>, %14, %cst_5 [1] : vector<2x1000xf32> to vector<2xf32>
    %16 = vector.shape_cast %15 : vector<2xf32> to vector<2x1xf32>
    %17 = math.log %16 : vector<2x1xf32>
    %18 = arith.addf %11, %17 : vector<2x1xf32>
    %19 = arith.subf %18, %9 : vector<2x1xf32>
    %20 = vector.shape_cast %19 : vector<2x1xf32> to vector<1x2x1xf32>
    %cst_6 = arith.constant dense<0.000000e+00> : vector<1xf32>
    %21 = vector.multi_reduction <add>, %20, %cst_6 [1, 2] : vector<1x2x1xf32> to vector<1xf32>
    %22 = vector.shape_cast %21 : vector<1xf32> to vector<1x1x1xf32>
    %23 = vector.extract %22[0, 0, 0] : f32 from vector<1x1x1xf32>
    %c0_7 = arith.constant 0 : index
    %c0_8 = arith.constant 0 : index
    %24 = vector.load %arg4[%c0_7, %c0_8] : memref<2x1000xbf16, #tpu.memory_space<vmem>>, vector<2x1000xbf16>
    %25 = arith.extf %24 : vector<2x1000xbf16> to vector<2x1000xf32>
    %26 = tpu.iota {dimensions = array<i32: 1>} : vector<2x1000xi32>
    %27 = vector.broadcast %0 : vector<2x1xi32> to vector<2x1000xi32>
    %28 = arith.cmpi eq, %26, %27 : vector<2x1000xi32>
    %cst_9 = arith.constant 0.000000e+00 : f32
    %29 = vector.broadcast %cst_9 : f32 to vector<2x1000xf32>
    %30 = arith.select %28, %25, %29 : vector<2x1000xi1>, vector<2x1000xf32>
    %cst_10 = arith.constant dense<0.000000e+00> : vector<2xf32>
    %31 = vector.multi_reduction <add>, %30, %cst_10 [1] : vector<2x1000xf32> to vector<2xf32>
    %32 = vector.shape_cast %31 : vector<2xf32> to vector<2x1xf32>
    %cst_11 = arith.constant dense<0xFF800000> : vector<2xf32>
    %33 = vector.multi_reduction <maximumf>, %25, %cst_11 [1] : vector<2x1000xf32> to vector<2xf32>
    %34 = vector.shape_cast %33 : vector<2xf32> to vector<2x1xf32>
    %35 = vector.broadcast %34 : vector<2x1xf32> to vector<2x1000xf32>
    %36 = arith.subf %25, %35 : vector<2x1000xf32>
    %37 = math.exp %36 : vector<2x1000xf32>
    %cst_12 = arith.constant dense<0.000000e+00> : vector<2xf32>
    %38 = vector.multi_reduction <add>, %37, %cst_12 [1] : vector<2x1000xf32> to vector<2xf32>
    %39 = vector.shape_cast %38 : vector<2xf32> to vector<2x1xf32>
    %40 = math.log %39 : vector<2x1xf32>
    %41 = arith.addf %34, %40 : vector<2x1xf32>
    %42 = arith.subf %41, %32 : vector<2x1xf32>
    %43 = vector.shape_cast %42 : vector<2x1xf32> to vector<1x2x1xf32>
    %cst_13 = arith.constant dense<0.000000e+00> : vector<1xf32>
    %44 = vector.multi_reduction <add>, %43, %cst_13 [1, 2] : vector<1x2x1xf32> to vector<1xf32>
    %45 = vector.shape_cast %44 : vector<1xf32> to vector<1x1x1xf32>
    %46 = vector.extract %45[0, 0, 0] : f32 from vector<1x1x1xf32>
    %47 = arith.addf %23, %46 : f32
    %c0_14 = arith.constant 0 : index
    %c0_15 = arith.constant 0 : index
    %48 = vector.load %arg2[%c0_14, %c0_15] : memref<2x1xf32, #tpu.memory_space<vmem>>, vector<2x1xf32>
    %49 = tpu.reciprocal %48 : vector<2x1xf32> -> vector<2x1xf32>
    %c0_16 = arith.constant 0 : index
    %c0_17 = arith.constant 0 : index
    %50 = vector.load %arg5[%c0_16, %c0_17] : memref<2x32xbf16, #tpu.memory_space<vmem>>, vector<2x32xbf16>
    %51 = arith.extf %50 : vector<2x32xbf16> to vector<2x32xf32>
    %c0_18 = arith.constant 0 : index
    %c0_19 = arith.constant 0 : index
    %52 = vector.load %arg6[%c0_18, %c0_19] : memref<2x32xbf16, #tpu.memory_space<vmem>>, vector<2x32xbf16>
    %53 = arith.extf %52 : vector<2x32xbf16> to vector<2x32xf32>
    %54 = arith.subf %51, %53 : vector<2x32xf32>
    %55 = vector.broadcast %49 : vector<2x1xf32> to vector<2x32xf32>
    %56 = arith.mulf %54, %55 : vector<2x32xf32>
    %57 = arith.mulf %56, %56 : vector<2x32xf32>
    %58 = vector.shape_cast %57 : vector<2x32xf32> to vector<1x2x32xf32>
    %cst_20 = arith.constant dense<0.000000e+00> : vector<1xf32>
    %59 = vector.multi_reduction <add>, %58, %cst_20 [1, 2] : vector<1x2x32xf32> to vector<1xf32>
    %60 = vector.shape_cast %59 : vector<1xf32> to vector<1x1x1xf32>
    %61 = vector.extract %60[0, 0, 0] : f32 from vector<1x1x1xf32>
    %cst_21 = arith.constant 0.000000e+00 : f32
    %62 = arith.addf %cst_21, %61 : f32
    %c0_22 = arith.constant 0 : index
    %c0_23 = arith.constant 0 : index
    %63 = vector.load %arg7[%c0_22, %c0_23] : memref<2x32xbf16, #tpu.memory_space<vmem>>, vector<2x32xbf16>
    %64 = arith.extf %63 : vector<2x32xbf16> to vector<2x32xf32>
    %c0_24 = arith.constant 0 : index
    %c0_25 = arith.constant 0 : index
    %65 = vector.load %arg8[%c0_24, %c0_25] : memref<2x32xbf16, #tpu.memory_space<vmem>>, vector<2x32xbf16>
    %66 = arith.extf %65 : vector<2x32xbf16> to vector<2x32xf32>
    %67 = arith.subf %64, %66 : vector<2x32xf32>
    %68 = vector.broadcast %49 : vector<2x1xf32> to vector<2x32xf32>
    %69 = arith.mulf %67, %68 : vector<2x32xf32>
    %70 = arith.mulf %69, %69 : vector<2x32xf32>
    %71 = vector.shape_cast %70 : vector<2x32xf32> to vector<1x2x32xf32>
    %cst_26 = arith.constant dense<0.000000e+00> : vector<1xf32>
    %72 = vector.multi_reduction <add>, %71, %cst_26 [1, 2] : vector<1x2x32xf32> to vector<1xf32>
    %73 = vector.shape_cast %72 : vector<1xf32> to vector<1x1x1xf32>
    %74 = vector.extract %73[0, 0, 0] : f32 from vector<1x1x1xf32>
    %75 = arith.addf %62, %74 : f32
    %76 = tpu.iota {dimensions = array<i32: 2>} : vector<1x8x128xi32>
    %c0_i32 = arith.constant 0 : i32
    %77 = vector.broadcast %c0_i32 : i32 to vector<1x8x128xi32>
    %78 = arith.cmpi eq, %76, %77 : vector<1x8x128xi32>
    %c1_i32 = arith.constant 1 : i32
    %79 = vector.broadcast %c1_i32 : i32 to vector<1x8x128xi32>
    %80 = arith.cmpi eq, %76, %79 : vector<1x8x128xi32>
    %cst_27 = arith.constant 0.000000e+00 : f32
    %81 = vector.broadcast %75 : f32 to vector<1x8x128xf32>
    %82 = vector.broadcast %cst_27 : f32 to vector<1x8x128xf32>
    %83 = arith.select %80, %81, %82 : vector<1x8x128xi1>, vector<1x8x128xf32>
    %84 = vector.broadcast %47 : f32 to vector<1x8x128xf32>
    %85 = arith.select %78, %84, %83 : vector<1x8x128xi1>, vector<1x8x128xf32>
    %c0_28 = arith.constant 0 : index
    %c0_29 = arith.constant 0 : index
    %c0_30 = arith.constant 0 : index
    %86 = vector.load %arg9[%c0_28, %c0_29, %c0_30] : memref<1x8x128xf32, #tpu.memory_space<vmem>>, vector<1x8x128xf32>
    tpu.vector_store %arg9[%c0_28, %c0_29, %c0_30], %85 {strides = array<i32>} : memref<1x8x128xf32, #tpu.memory_space<vmem>>, vector<1x8x128xf32>,
    return
  }
  func.func @transform_0(%arg0: i32) -> (i32, i32) {
    %c0_i32 = arith.constant 0 : i32
    %c0_i32_0 = arith.constant 0 : i32
    return %arg0, %c0_i32 : i32, i32
  }
  func.func @transform_1(%arg0: i32) -> (i32, i32) {
    %c0_i32 = arith.constant 0 : i32
    %c0_i32_0 = arith.constant 0 : i32
    return %arg0, %c0_i32 : i32, i32
  }
  func.func @transform_2(%arg0: i32) -> (i32, i32) {
    %c0_i32 = arith.constant 0 : i32
    %c0_i32_0 = arith.constant 0 : i32
    return %arg0, %c0_i32 : i32, i32
  }
  func.func @transform_3(%arg0: i32) -> (i32, i32) {
    %c0_i32 = arith.constant 0 : i32
    %c0_i32_0 = arith.constant 0 : i32
    return %arg0, %c0_i32 : i32, i32
  }
  func.func @transform_4(%arg0: i32) -> (i32, i32) {
    %c0_i32 = arith.constant 0 : i32
    %c0_i32_0 = arith.constant 0 : i32
    return %arg0, %c0_i32 : i32, i32
  }
  func.func @transform_5(%arg0: i32) -> (i32, i32) {
    %c0_i32 = arith.constant 0 : i32
    %c0_i32_0 = arith.constant 0 : i32
    return %arg0, %c0_i32 : i32, i32
  }
  func.func @transform_6(%arg0: i32) -> (i32, i32) {
    %c0_i32 = arith.constant 0 : i32
    %c0_i32_0 = arith.constant 0 : i32
    return %arg0, %c0_i32 : i32, i32
  }
  func.func @transform_7(%arg0: i32) -> (i32, i32) {
    %c0_i32 = arith.constant 0 : i32
    %c0_i32_0 = arith.constant 0 : i32
    return %arg0, %c0_i32 : i32, i32
  }
  func.func @transform_8(%arg0: i32) -> (i32, i32, i32) {
    %c0_i32 = arith.constant 0 : i32
    %c0_i32_0 = arith.constant 0 : i32
    %c0_i32_1 = arith.constant 0 : i32
    return %arg0, %c0_i32, %c0_i32_0 : i32, i32, i32
  }
}

</mosaic_0001>

<bundles_post_ra>
// kernel: tpu_custom_call.1
= control target key start
LH: loop header
LB: loop body
LE: loop exit
PB: predicated region body
PF: predicated region fallthrough
CT: control target
= control target key end

     0   :  { %13 = vsyncpa [#allocation3], 0  ;;  %s839_s0 = inlined_call_operand.vmem [shape: s32[2,1], index: 0, kind: input, shape index: {}]   ;;  %s840_s1 = inlined_call_operand.vmem [shape: f32[2,1], index: 1, kind: input, shape index: {}]   ;;  %s841_s2 = inlined_call_operand.vmem [shape: bf16[2,1000], index: 2, kind: input, shape index: {}]   ;;  %s842_s3 = inlined_call_operand.hbm [shape: bf16[2,1000], index: 3, kind: input, shape index: {}]   ;;  %s843_s4 = inlined_call_operand.vmem [shape: bf16[2,32], index: 4, kind: input, shape index: {}]   ;;  %s844_s5 = inlined_call_operand.vmem [shape: bf16[2,32], index: 5, kind: input, shape index: {}]   ;;  %s845_s6 = inlined_call_operand.vmem [shape: bf16[2,32], index: 6, kind: input, shape index: {}]   ;;  %s846_s7 = inlined_call_operand.vmem [shape: bf16[2,32], index: 7, kind: input, shape index: {}]   ;;  %s847_s8 = inlined_call_operand.hbm [shape: f32[1,8,128], index: 8, kind: output, shape index: {}]  }
   0x1   :  { %14 = vsyncpa [#allocation4], 0  ;;  %s564_s27 = smov [#allocation2]  }
   0x2   :  { %s27_s28 = sshll.u32 %s564_s27, 4  ;;  %s28_s28 = int_to_ptr.vmem [resolvable:$true] %s27_s28 }
   0x3   :  { %s528_s29 = scalar_lea.vmem %s28_s28, 128  ;;  %p533_p1 = scmp.lt.s32.totalorder %s28_s28, %s28_s28 }
   0x4   :  { %p529_p0 = scmp.ne.s32.totalorder %s28_s28, %s528_s29  ;;  %p534_p2 = scmp.lt.s32.totalorder %s528_s29, %s528_s29 }
   0x6   :  { %p535_p3 = por %p534_p2, %p533_p1 }
   0x8   :  { %p536_p4 = pnand %p535_p3, %p529_p0 }
   0xa   :  { %539 = shalt.err (!%p536_p4)
}
   0xb   :  { %30 = dma.hbm_to_vmem [thread:$0]  %s842_s3, 128, %s28_s28, [#allocation3]  }
   0xc   :  { %560 = dma.done.wait [#allocation3], 128  }
   0xd   :  { %561 = vsyncadd [#allocation3], 4294967168  ;;  %v46_v0 = vlaneseq  ;;  %v565_v1 = vmov 1983009808   ;;  %v566_v4 = vmov 0   ;;  %v43_v7 = vld [vmem:[%s841_s2] sm:$0xff] }
   0xe   :  { %v70_v2 = vunpack.c.l.s4 %v565_v1  ;;  %504 = vset.pattern.permute.xlu1 %v566_v4  ;;  %505 = vset.pattern.permute.xlu0 %v566_v4  ;;  %v245_v8 = vld [vmem:[#allocation2] sm:$0xff]  ;;  %v629_v10 = vunpack.c.l.bf16 %v43_v7  ;;  %v631_v11 = vunpack.c.h.bf16 %v43_v7  ;;  %vm118_vm0 = vcmask 1041408   ;;  %s568_s22 = smov [#allocation5]  }
   0xf   :  { %v618_v3 = vshrl.u32 %v46_v0, 7  ;;  %v42_v9 = vld [vmem:[%s839_s0] sm:$0x3]  ;;  %v633_v12 = vunpack.c.l.bf16 %v245_v8  ;;  %v635_v13 = vunpack.c.h.bf16 %v245_v8  ;;  %vm132_vm1 = vcmask 844800   ;;  %s482_s23 = sshll.u32 %s568_s22, 4  ;;  %s483_s23 = int_to_ptr.vmem [resolvable:$true] %s482_s23 }
  0x10   :  { %v71_v5 = vunpack.c.0.s8 %v70_v2  ;;  %56 = vperm.xlu1 %504, %v42_v9   ;;  %v68_v14 = vcombine.high %v629_v10, %v629_v10  ;;  %v85_v16 = vcombine.high %v631_v11, %v631_v11  ;;  %v724_v1 = vand.u32 127, %v46_v0  ;;  %s540_s24 = scalar_lea.vmem %s483_s23, 128  ;;  %p545_p6 = scmp.lt.s32.totalorder %s483_s23, %s483_s23 }
  0x11   :  { %v250_v18 = vcombine.high %v633_v12, %v633_v12  ;;  %v267_v20 = vcombine.high %v635_v13, %v635_v13  ;;  %vm439_vm10 = vcmask 254976   ;;  %vm234_vm11 = vcmask 1024   ;;  %p541_p5 = scmp.ne.s32.totalorder %s483_s23, %s540_s24  ;;  %p546_p7 = scmp.lt.s32.totalorder %s540_s24, %s540_s24 }
  0x12   :  { %v621_v6 = vsub.s32 %v71_v5, %v618_v3  ;;  %v48_v2 = vadd.s32 128, %v724_v1  ;;  %v49_v4 = vadd.s32 256, %v724_v1  ;;  %v50_v5 = vadd.s32 384, %v724_v1 }
  0x13   :  { %v51_v7 = vadd.s32 512, %v724_v1  ;;  %v52_v9 = vadd.s32 640, %v724_v1  ;;  %vm470_vm12 = vcmp.eq.s32.totalorder %v724_v1, 1  ;;  %vm469_vm13 = vcmp.eq.s32.totalorder %v724_v1, 0  ;;  %p547_p8 = por %p546_p7, %p545_p6 }
  0x14   :  { %v641_v15 = vrot.slane %v629_v10, %v621_v6  ;;  %v647_v17 = vrot.slane %v631_v11, %v621_v6  ;;  %v653_v19 = vrot.slane %v633_v12, %v621_v6  ;;  %v659_v21 = vrot.slane %v635_v13, %v621_v6 }
  0x15   :  { %v82_v22 = vrot.slane %v68_v14, %v621_v6  ;;  %v665_v24 = vrot.slane %v85_v16, %v621_v6  ;;  %v676_v28 = vrot.slane %v250_v18, %v621_v6  ;;  %v698_v43 = vrot.slane %v267_v20, %v621_v6  ;;  %p548_p9 = pnand %p547_p8, %p541_p5 }
  0x16   :  { %v83_v23 = vcombine.high %v641_v15, %v641_v15  ;;  %v669_v25 = vcombine.high %v647_v17, %v647_v17  ;;  %v137_v26 = vsel %vm118_vm0, %v641_v15, -inf  ;;  %v141_v27 = vsel %vm118_vm0, %v647_v17, -inf }
  0x17   :  { %v680_v29 = vcombine.high %v653_v19, %v653_v19  ;;  %v84_v30 = vcombine.high %v82_v22, %v82_v22  ;;  %v684_v31 = vcombine.high %v665_v24, %v665_v24  ;;  %v139_v33 = vsel %vm118_vm0, %v82_v22, -inf }
  0x18   :  { %v138_v32 = vsel %vm118_vm0, %v83_v23, -inf  ;;  %v142_v34 = vmax.f32 %v137_v26, %v141_v27  ;;  %v143_v35 = vsel %vm118_vm0, %v669_v25, -inf  ;;  %v145_v36 = vsel %vm118_vm0, %v665_v24, -inf }
  0x19   :  { %v266_v37 = vcombine.high %v676_v28, %v676_v28  ;;  %v140_v38 = vsel %vm118_vm0, %v84_v30, -inf  ;;  %v144_v39 = vmax.f32 %v138_v32, %v143_v35  ;;  %v146_v40 = vmax.f32 %v139_v33, %v145_v36 }
  0x1a   :  { %v147_v41 = vsel %vm132_vm1, %v684_v31, -inf  ;;  %v702_v44 = vcombine.high %v659_v21, %v659_v21  ;;  %v317_v45 = vsel %vm118_vm0, %v653_v19, -inf  ;;  %v318_v47 = vsel %vm118_vm0, %v680_v29, -inf }
  0x1b   :  { %v148_v42 = vmax.f32 %v140_v38, %v147_v41  ;;  %v149_v46 = vmax.f32 %v142_v34, %v144_v39  ;;  %v319_v48 = vsel %vm118_vm0, %v676_v28, -inf  ;;  %v320_v49 = vsel %vm118_vm0, %v266_v37, -inf }
  0x1c   :  { %v713_v51 = vcombine.high %v698_v43, %v698_v43  ;;  %v321_v52 = vsel %vm118_vm0, %v659_v21, -inf  ;;  %v323_v53 = vsel %vm118_vm0, %v702_v44, -inf  ;;  %v325_v56 = vsel %vm118_vm0, %v698_v43, -inf }
  0x1d   :  { %v150_v50 = vmax.f32 %v146_v40, %v148_v42  ;;  %v322_v54 = vmax.f32 %v317_v45, %v321_v52  ;;  %v324_v55 = vmax.f32 %v318_v47, %v323_v53  ;;  %v326_v58 = vmax.f32 %v319_v48, %v325_v56 }
  0x1e   :  { %v327_v59 = vsel %vm132_vm1, %v713_v51, -inf  ;;  %v53_v14 = vadd.s32 768, %v724_v1  ;;  %v54_v20 = vadd.s32 896, %v724_v1 }
  0x1f   :  { %v151_v57 = vmax.f32 %v149_v46, %v150_v50  ;;  %v328_v60 = vmax.f32 %v320_v49, %v327_v59  ;;  %v329_v61 = vmax.f32 %v322_v54, %v324_v55 }
  0x21   :  { %152 = vmax.xlane.f32.xlu0 %v151_v57  ;;  %v330_v62 = vmax.f32 %v326_v58, %v328_v60  ;;  %v567_v58 = vmov 269488144  }
  0x22   :  { %v156_v59 = vunpack.c.l.s4 %v567_v58 }
  0x23   :  { %v331_v63 = vmax.f32 %v329_v61, %v330_v62 }
  0x25   :  { %332 = vmax.xlane.f32.xlu0 %v331_v63  ;;  %v157_v63 = vunpack.c.0.s8 %v156_v59 }
  0x8b   :  { %v57_v8 = vpop.permute.xlu1 %56 }
  0x8c   :  { %vm58_vm2 = vcmp.eq.s32.totalorder %v724_v1, %v57_v8  ;;  %vm59_vm3 = vcmp.eq.s32.totalorder %v48_v2, %v57_v8  ;;  %vm60_vm4 = vcmp.eq.s32.totalorder %v49_v4, %v57_v8  ;;  %vm61_vm5 = vcmp.eq.s32.totalorder %v50_v5, %v57_v8 }
  0x8d   :  { %vm62_vm6 = vcmp.eq.s32.totalorder %v51_v7, %v57_v8  ;;  %v110_v0 = vsel %vm58_vm2, %v641_v15, 0.0  ;;  %v111_v16 = vsel %vm59_vm3, %v83_v23, 0.0  ;;  %v112_v18 = vsel %vm60_vm4, %v82_v22, 0.0 }
  0x8e   :  { %v113_v26 = vsel %vm61_vm5, %v84_v30, 0.0  ;;  %vm63_vm7 = vcmp.eq.s32.totalorder %v52_v9, %v57_v8  ;;  %v119_v27 = vsel %vm118_vm0, %v110_v0, 0.0  ;;  %v120_v32 = vsel %vm118_vm0, %v111_v16, 0.0 }
  0x8f   :  { %v122_v33 = vsel %vm118_vm0, %v112_v18, 0.0  ;;  %vm64_vm8 = vcmp.eq.s32.totalorder %v53_v14, %v57_v8  ;;  %v114_v34 = vsel %vm62_vm6, %v647_v17, 0.0  ;;  %v121_v15 = vadd.f32 %v120_v32, %v119_v27 }
  0x90   :  { %v124_v23 = vsel %vm118_vm0, %v113_v26, 0.0  ;;  %v292_v22 = vsel %vm58_vm2, %v653_v19, 0.0  ;;  %v293_v30 = vsel %vm59_vm3, %v680_v29, 0.0  ;;  %v294_v35 = vsel %vm60_vm4, %v676_v28, 0.0 }
  0x91   :  { %vm65_vm9 = vcmp.eq.s32.totalorder %v54_v20, %v57_v8  ;;  %v115_v36 = vsel %vm63_vm7, %v669_v25, 0.0  ;;  %v123_v38 = vadd.f32 %v122_v33, %v121_v15  ;;  %v295_v17 = vsel %vm61_vm5, %v266_v37, 0.0 }
  0x92   :  { %v116_v39 = vsel %vm64_vm8, %v665_v24, 0.0  ;;  %v126_v40 = vsel %vm118_vm0, %v114_v34, 0.0  ;;  %v300_v19 = vsel %vm118_vm0, %v292_v22, 0.0  ;;  %v301_v41 = vsel %vm118_vm0, %v293_v30, 0.0 }
  0x93   :  { %v125_v29 = vadd.f32 %v124_v23, %v123_v38  ;;  %v296_v28 = vsel %vm62_vm6, %v659_v21, 0.0  ;;  %v302_v42 = vadd.f32 %v301_v41, %v300_v19  ;;  %v303_v45 = vsel %vm118_vm0, %v294_v35, 0.0 }
  0x94   :  { %v128_v25 = vsel %vm118_vm0, %v115_v36, 0.0  ;;  %v305_v37 = vsel %vm118_vm0, %v295_v17, 0.0  ;;  %v117_v24 = vsel %vm65_vm9, %v684_v31, 0.0  ;;  %v297_v47 = vsel %vm63_vm7, %v702_v44, 0.0 }
  0x95   :  { %v127_v46 = vadd.f32 %v126_v40, %v125_v29  ;;  %v304_v48 = vadd.f32 %v303_v45, %v302_v42  ;;  %v130_v49 = vsel %vm118_vm0, %v116_v39, 0.0  ;;  %v307_v50 = vsel %vm118_vm0, %v296_v28, 0.0 }
  0x96   :  { %v298_v52 = vsel %vm64_vm8, %v698_v43, 0.0  ;;  %v133_v54 = vsel %vm132_vm1, %v117_v24, 0.0  ;;  %v309_v55 = vsel %vm118_vm0, %v297_v47, 0.0  ;;  %v299_v31 = vsel %vm65_vm9, %v713_v51, 0.0 }
  0x97   :  { %v129_v21 = vadd.f32 %v128_v25, %v127_v46  ;;  %v306_v53 = vadd.f32 %v305_v37, %v304_v48  ;;  %v311_v44 = vsel %vm118_vm0, %v298_v52, 0.0  ;;  %v313_v62 = vsel %vm132_vm1, %v299_v31, 0.0 }
  0x98   :  { %v160_v4 = vsub.s32 %v157_v63, %v618_v3 }
  0x99   :  { %v131_v56 = vadd.f32 %v130_v49, %v129_v21  ;;  %v308_v57 = vadd.f32 %v307_v50, %v306_v53 }
  0x9b   :  { %v134_v60 = vadd.f32 %v133_v54, %v131_v56  ;;  %v310_v61 = vadd.f32 %v309_v55, %v308_v57 }
  0x9d   :  { %135 = vadd.xlane.f32.xlu0 %v134_v60  ;;  %v312_v43 = vadd.f32 %v311_v44, %v310_v61 }
  0x9f   :  { %v314_v2 = vadd.f32 %v313_v62, %v312_v43 }
  0xa1   :  { %315 = vadd.xlane.f32.xlu0 %v314_v2 }
  0xaa   :  { %v781_v5 = vpop.xlane.xlu0 %152 }
  0xab   :  { %v161_v51 = vrot.slane %v781_v5, %v160_v4 }
  0xad   :  { %v163_v7 = vsub.f32 %v629_v10, %v161_v51  ;;  %v164_v8 = vsub.f32 %v631_v11, %v161_v51 }
  0xae   :  { %v786_v0 = vpop.xlane.xlu0 %332 }
  0xaf   :  { %v165_v9 = vmul.f32 1.442695, %v163_v7  ;;  %v167_v14 = vmul.f32 1.442695, %v164_v8  ;;  %v341_v16 = vrot.slane %v786_v0, %v160_v4 }
  0xb1   :  { %506 = vpow2.f32 %v165_v9  ;;  %v343_v18 = vsub.f32 %v633_v12, %v341_v16  ;;  %v344_v3 = vsub.f32 %v635_v13, %v341_v16  ;;  %v425_v9 = vld [vmem:[%s840_s1] sm:$0x3] }
  0xb2   :  { %508 = vpow2.f32 %v167_v14 }
  0xb3   :  { %v345_v20 = vmul.f32 1.442695, %v343_v18  ;;  %v347_v26 = vmul.f32 1.442695, %v344_v3 }
  0xb5   :  { %510 = vpow2.f32 %v345_v20  ;;  %v427_v20 = vld [vmem:[%s843_s4] sm:$0x1] }
  0xb6   :  { %512 = vpow2.f32 %v347_v26  ;;  %v429_v26 = vld [vmem:[%s844_s5] sm:$0x1] }
  0xb7   :  { %514 = vrcp.f32 %v425_v9 }
  0xbe   :  { %v507_v27 = vpop.eup %506 }
  0xbf   :  { %v509_v10 = vpop.eup %508  ;;  %v171_v32 = vcombine.high %v507_v27, %v507_v27  ;;  %v178_v11 = vrot.slane %v507_v27, %v621_v6 }
  0xc0   :  { %v188_v15 = vcombine.high %v509_v10, %v509_v10  ;;  %v195_v30 = vrot.slane %v509_v10, %v621_v6  ;;  %v428_v10 = vunpack.c.l.bf16 %v427_v20 }
  0xc1   :  { %v185_v33 = vrot.slane %v171_v32, %v621_v6  ;;  %v186_v34 = vcombine.high %v178_v11, %v178_v11  ;;  %v213_v12 = vsel %vm118_vm0, %v178_v11, 0.0  ;;  %v430_v32 = vunpack.c.l.bf16 %v429_v26 }
  0xc2   :  { %v511_v23 = vpop.eup %510  ;;  %v202_v40 = vrot.slane %v188_v15, %v621_v6  ;;  %v203_v41 = vcombine.high %v195_v30, %v195_v30  ;;  %v220_v25 = vsel %vm118_vm0, %v195_v30, 0.0 }
  0xc3   :  { %v187_v22 = vcombine.high %v185_v33, %v185_v33  ;;  %v214_v13 = vsel %vm118_vm0, %v186_v34, 0.0  ;;  %v513_v36 = vpop.eup %512  ;;  %v216_v38 = vsel %vm118_vm0, %v185_v33, 0.0  ;;  %v351_v17 = vcombine.high %v511_v23, %v511_v23  ;;  %v451_v33 = vld [vmem:[%s845_s6] sm:$0x1] }
  0xc4   :  { %v215_v35 = vadd.f32 %v214_v13, %v213_v12  ;;  %v358_v39 = vrot.slane %v511_v23, %v621_v6  ;;  %v368_v37 = vcombine.high %v513_v36, %v513_v36  ;;  %v375_v46 = vrot.slane %v513_v36, %v621_v6  ;;  %v515_v14 = vpop.eup %514  ;;  %v453_v34 = vld [vmem:[%s846_s7] sm:$0x1] }
  0xc5   :  { %v218_v29 = vsel %vm118_vm0, %v187_v22, 0.0  ;;  %v365_v28 = vrot.slane %v351_v17, %v621_v6  ;;  %v204_v21 = vcombine.high %v202_v40, %v202_v40  ;;  %v222_v52 = vsel %vm118_vm0, %v203_v41, 0.0 }
  0xc6   :  { %v217_v19 = vadd.f32 %v216_v38, %v215_v35  ;;  %v366_v42 = vcombine.high %v358_v39, %v358_v39  ;;  %v393_v47 = vsel %vm118_vm0, %v358_v39, 0.0  ;;  %v224_v56 = vsel %vm118_vm0, %v202_v40, 0.0 }
  0xc7   :  { %v367_v24 = vcombine.high %v365_v28, %v365_v28  ;;  %v396_v53 = vsel %vm118_vm0, %v365_v28, 0.0  ;;  %v382_v31 = vrot.slane %v368_v37, %v621_v6  ;;  %v383_v57 = vcombine.high %v375_v46, %v375_v46 }
  0xc8   :  { %v219_v45 = vadd.f32 %v218_v29, %v217_v19  ;;  %v394_v48 = vsel %vm118_vm0, %v366_v42, 0.0  ;;  %v226_v60 = vsel %vm132_vm1, %v204_v21, 0.0  ;;  %v400_v61 = vsel %vm118_vm0, %v375_v46, 0.0 }
  0xc9   :  { %v395_v50 = vadd.f32 %v394_v48, %v393_v47  ;;  %v398_v44 = vsel %vm118_vm0, %v367_v24, 0.0  ;;  %v384_v63 = vcombine.high %v382_v31, %v382_v31  ;;  %v402_v2 = vsel %vm118_vm0, %v383_v57, 0.0 }
  0xca   :  { %v221_v49 = vadd.f32 %v220_v25, %v219_v45  ;;  %v404_v51 = vsel %vm118_vm0, %v382_v31, 0.0  ;;  %v431_v11 = vsub.f32 %v428_v10, %v430_v32  ;;  %v452_v30 = vunpack.c.l.bf16 %v451_v33 }
  0xcb   :  { %v397_v55 = vadd.f32 %v396_v53, %v395_v50  ;;  %v406_v6 = vsel %vm132_vm1, %v384_v63, 0.0  ;;  %v454_v12 = vunpack.c.l.bf16 %v453_v34 }
  0xcc   :  { %v223_v54 = vadd.f32 %v222_v52, %v221_v49 }
  0xcd   :  { %v399_v59 = vadd.f32 %v398_v44, %v397_v55  ;;  %v455_v38 = vsub.f32 %v452_v30, %v454_v12 }
  0xce   :  { %v225_v58 = vadd.f32 %v224_v56, %v223_v54 }
  0xcf   :  { %v401_v43 = vadd.f32 %v400_v61, %v399_v59 }
  0xd0   :  { %v227_v62 = vadd.f32 %v226_v60, %v225_v58 }
  0xd1   :  { %v403_v4 = vadd.f32 %v402_v2, %v401_v43 }
  0xd2   :  { %228 = vadd.xlane.f32.xlu1 %v227_v62 }
  0xd3   :  { %v405_v7 = vadd.f32 %v404_v51, %v403_v4 }
  0xd5   :  { %v407_v8 = vadd.f32 %v406_v6, %v405_v7 }
  0xd7   :  { %408 = vadd.xlane.f32.xlu0 %v407_v8 }
  0xed   :  { %434 = vperm.xlu0 %505, %v515_v14  }
 0x126   :  { %v136_v16 = vpop.xlane.xlu0 %135 }
 0x12a   :  { %v316_v3 = vpop.xlane.xlu0 %315 }
 0x15b   :  { %v229_v18 = vpop.xlane.xlu1 %228 }
 0x15c   :  { %516 = vlog2.f32 %v229_v18 }
 0x160   :  { %v409_v27 = vpop.xlane.xlu0 %408 }
 0x161   :  { %518 = vlog2.f32 %v409_v27 }
 0x168   :  { %v435_v23 = vpop.permute.xlu0 %434 }
 0x169   :  { %v517_v15 = vpop.eup %516  ;;  %v437_v13 = vmul.f32 %v435_v23, %v431_v11  ;;  %v456_v29 = vmul.f32 %v455_v38, %v435_v23 }
 0x16a   :  { %v231_v22 = vmul.f32 0.6931472, %v517_v15 }
 0x16b   :  { %v438_v35 = vmul.f32 %v437_v13, %v437_v13  ;;  %v457_v45 = vmul.f32 %v456_v29, %v456_v29 }
 0x16c   :  { %v232_v36 = vadd.f32 %v231_v22, %v781_v5 }
 0x16d   :  { %v440_v17 = vsel %vm439_vm10, %v438_v35, 0.0  ;;  %v458_v37 = vsel %vm439_vm10, %v457_v45, 0.0 }
 0x16e   :  { %v233_v39 = vsub.f32 %v232_v36, %v136_v16  ;;  %v519_v40 = vpop.eup %518  ;;  %441 = vadd.xlane.f32.xlu1 %v440_v17 }
 0x16f   :  { %v411_v19 = vmul.f32 0.6931472, %v519_v40 }
 0x170   :  { %v235_v41 = vsel %vm234_vm11, %v233_v39, 0.0 }
 0x171   :  { %v412_v28 = vadd.f32 %v411_v19, %v786_v0 }
 0x172   :  { %236 = vadd.xlane.f32.xlu1 %v235_v41 }
 0x173   :  { %v413_v42 = vsub.f32 %v412_v28, %v316_v3 }
 0x175   :  { %v414_v25 = vsel %vm234_vm11, %v413_v42, 0.0 }
 0x176   :  { %415 = vadd.xlane.f32.xlu1 %v414_v25 }
 0x17a   :  { %459 = vadd.xlane.f32.xlu1 %v458_v37 }
 0x1f7   :  { %v442_v5 = vpop.xlane.xlu1 %441 }
 0x1f8   :  { %v443_v24 = vrot.slane %v442_v5, 4 }
 0x1fa   :  { %v444_v46 = vadd.f32 %v443_v24, %v442_v5 }
 0x1fb   :  { %v237_v47 = vpop.xlane.xlu1 %236 }
 0x1fc   :  { %v238_v48 = vrot.slane %v237_v47, 4  ;;  %v445_v50 = vrot.slane %v444_v46, 2 }
 0x1fe   :  { %v239_v49 = vadd.f32 %v238_v48, %v237_v47  ;;  %v446_v56 = vadd.f32 %v445_v50, %v444_v46 }
 0x1ff   :  { %v416_v21 = vpop.xlane.xlu1 %415 }
 0x200   :  { %v240_v52 = vrot.slane %v239_v49, 2  ;;  %v417_v53 = vrot.slane %v416_v21, 4  ;;  %v447_v61 = vrot.slane %v446_v56, 1 }
 0x202   :  { %v418_v54 = vadd.f32 %v417_v53, %v416_v21  ;;  %v241_v0 = vadd.f32 %v240_v52, %v239_v49  ;;  %v448_v4 = vadd.f32 %v447_v61, %v446_v56 }
 0x203   :  { %v460_v55 = vpop.xlane.xlu1 %459 }
 0x204   :  { %v419_v31 = vrot.slane %v418_v54, 2  ;;  %v461_v57 = vrot.slane %v460_v55, 4  ;;  %v242_v44 = vrot.slane %v241_v0, 1 }
 0x206   :  { %v462_v58 = vadd.f32 %v461_v57, %v460_v55  ;;  %v243_v59 = vadd.f32 %v242_v44, %v241_v0  ;;  %v420_v60 = vadd.f32 %v419_v31, %v418_v54 }
 0x208   :  { %v463_v62 = vrot.slane %v462_v58, 2  ;;  %491 = vpush %v243_v59  ;;  %v421_v43 = vrot.slane %v420_v60, 1 }
 0x20a   :  { %v464_v63 = vadd.f32 %v463_v62, %v462_v58  ;;  %v422_v2 = vadd.f32 %v421_v43, %v420_v60 }
 0x20c   :  { %493 = vpush %v422_v2  ;;  %v465_v51 = vrot.slane %v464_v63, 1 }
 0x20d   :  { %495 = vpush %v448_v4 }
 0x20e   :  { %v466_v7 = vadd.f32 %v465_v51, %v464_v63 }
 0x210   :  { %497 = vpush %v466_v7 }
 0x239   :  { %s492_s4 = spop %491 }
 0x23d   :  { %s494_s5 = spop %493 }
 0x23e   :  { %s496_s6 = spop %495  ;;  %s424_s7 = sadd.f32 %s494_s5, %s492_s4 }
 0x240   :  { %v473_v8 = vstv %s424_s7 }
 0x241   :  { %s498_s20 = spop %497 }
 0x242   :  { %s468_s21 = sadd.f32 %s498_s20, %s496_s6 }
 0x244   :  { %v471_v6 = vstv %s468_s21 }
 0x245   :  { %v472_v9 = vsel %vm470_vm12, %v471_v6, 0.0 }
 0x246   :  { %v474_v14 = vsel %vm469_vm13, %v473_v8, %v472_v9 }
 0x247   :  { %475 = vst [vmem:[#allocation5] sm:$0xff] %v474_v14 }
 0x248   :  { %551 = shalt.err (!%p548_p9)
}
 0x249   :  { %485 = dma.vmem_to_hbm [thread:$0]  %s483_s23, 128, %s847_s8, [#allocation4]  }
 0x24a   :  { %562 = dma.done.wait [#allocation4], 128  }
 0x24b   :  { %563 = vsyncadd [#allocation4], 4294967168 }
 0x24c   :  { %489 = vsyncpa [#allocation3], 1 }
 0x24d   :  { %490 = vsyncpa [#allocation4], 1 }

</bundles_post_ra>
